<compile_context>
chip_gen: v5e
topology: v5e:2x2
jax: 0.10.0
libtpu: 0.0.40
codegen_flags: <defaults>
</compile_context>

<pallas_src>
import functools

import jax
import jax.numpy as jnp
from jax.experimental import pallas as pl
from jax.experimental.pallas import tpu as pltpu

EP = 0.1     # self.ep
BETA = 10.0  # self.beta
ALPHA = 2.0  # self.alpha
LMDA = 1.0   # self.lmda


def _round_up(x, m):
    return ((x + m - 1) // m) * m


def _device_caps():
    """(vmem_cap_bytes, preferred_block_k) for the attached TPU generation."""
    kind = ""
    try:
        kind = jax.devices()[0].device_kind.lower()
    except Exception:
        pass
    if "v5 lite" in kind or "v5e" in kind or "v5litepod" in kind:
        return 100 << 20, 128          # 128 MiB physical VMEM, 128-wide MXU
    if "v7" in kind:
        return 56 << 20, 256           # 64 MiB physical: leave Mosaic headroom
    if "v6" in kind:
        return 100 << 20, 256          # 128 MiB physical, 256x256 MXU
    return 56 << 20, 128               # unknown / conservative default


def _resident_spec(b_pad, d_pad):
    """Spec for the resident inputs block: constant index_map -> single buffer."""
    try:
        return pl.BlockSpec((b_pad, d_pad), lambda i: (0, 0),
                            pipeline_mode=pl.Buffered(1))
    except Exception:  # older jax without pipeline_mode / Buffered
        return pl.BlockSpec((b_pad, d_pad), lambda i: (0, 0))


def _ms_loss_kernel(f_ref, all_ref, out_ref, *, n_valid, k_valid):
    tk = f_ref.shape[0]
    b_pad = all_ref.shape[0]
    k0 = pl.program_id(0) * tk          # global anchor offset of this tile

    # ---- similarities on the MXU: NT contraction (both operands contract their
    #      last dim) so the bf16 RHS is fed natively, no XLU transpose ----
    sim = jax.lax.dot_general(
        f_ref[...], all_ref[...],
        dimension_numbers=(((1,), (1,)), ((), ())),
        preferred_element_type=jnp.float32)                       # (tk, b_pad) f32

    # ---- mining masks from d = col - 5*row, built from a (tk,1) column and a
    #      broadcast subtract (no full-width row iota / int multiply) ----
    col = jax.lax.broadcasted_iota(jnp.int32, (tk, b_pad), 1)
    row5 = (jax.lax.broadcasted_iota(jnp.int32, (tk, 1), 0) + k0) * 5
    du = (col - row5).astype(jnp.uint32)       # negative d wraps to huge values
    col_ok = col < n_valid
    neg_mask = (du > 4) & col_ok               # d < 0 or d > 4, excl. padded cols
    pos_mask = (du - 1) <= 3                   # d in {1,2,3,4} (always < n_valid)

    # ---- hard-example mining thresholds (same predicates as the torch loops) ----
    neg_max = jnp.max(jnp.where(neg_mask, sim, -jnp.inf), axis=1, keepdims=True)
    pos_min = jnp.min(jnp.where(pos_mask, sim, jnp.inf), axis=1, keepdims=True)

    pos_sel = pos_mask & (sim < neg_max + EP)
    neg_sel = neg_mask & (sim > pos_min - EP)

    # ---- overflow-safe log(1 + sum_sel exp(x)):
    #      m = max(max_sel x, 0);  result = m + log(sum_sel exp(x-m) + exp(-m)).
    #      Empty selection -> 0, matching the reference's log(0 + 1). ----
    x_p = jnp.where(pos_sel, -ALPHA * (sim - LMDA), -jnp.inf)
    m_p = jnp.maximum(jnp.max(x_p, axis=1, keepdims=True), 0.0)
    s_p = jnp.sum(jnp.exp(x_p - m_p), axis=1, keepdims=True)
    loss_p = (m_p + jnp.log(s_p + jnp.exp(-m_p))) / ALPHA          # (tk, 1)

    x_n = jnp.where(neg_sel, BETA * (sim - LMDA), -jnp.inf)
    m_n = jnp.maximum(jnp.max(x_n, axis=1, keepdims=True), 0.0)
    s_n = jnp.sum(jnp.exp(x_n - m_n), axis=1, keepdims=True)
    loss_n = (m_n + jnp.log(s_n + jnp.exp(-m_n))) / BETA           # (tk, 1)

    p_cnt = jnp.sum(pos_sel.astype(jnp.float32), axis=1, keepdims=True)
    n_cnt = jnp.sum(neg_sel.astype(jnp.float32), axis=1, keepdims=True)

    # ---- mask padded anchor rows and reduce to per-tile scalars ----
    valid = (jax.lax.broadcasted_iota(jnp.int32, (tk, 1), 0) + k0) < k_valid
    validf = valid.astype(jnp.float32)
    loss_11 = jnp.sum((loss_p + loss_n) * validf, axis=0, keepdims=True)  # (1,1)
    p_11 = jnp.sum(p_cnt * validf, axis=0, keepdims=True)
    n_11 = jnp.sum(n_cnt * validf, axis=0, keepdims=True)

    # ---- pack the three partials into one lane-dense (8,128) block:
    #      lane 0 = loss, lane 1 = p_num, lane 2 = n_num ----
    lane = jax.lax.broadcasted_iota(jnp.int32, (8, 128), 1)
    packed = jnp.where(lane == 0, loss_11, jnp.where(lane == 1, p_11, n_11))
    out_ref[...] = packed[None]


def multi_similarity_loss(inputs, targets=None, *, block_k=None):
    """inputs: (B, D) float array, B a multiple of 5.  `targets` is unused,
    exactly as in the PyTorch reference forward()."""
    del targets  # dead code in the reference forward()
    B, D = inputs.shape
    assert B % 5 == 0, "batch must be a multiple of 5 (anchor + 4 positives)"
    K = B // 5

    vmem_cap, pref_tk = _device_caps()
    blk = block_k if block_k is not None else pref_tk

    # bf16 storage dtype for DMA / MXU; loss math stays f32 inside the kernel.
    inputs_bf = inputs.astype(jnp.bfloat16)
    f = inputs_bf[0::5]                                   # (K, D) anchors

    D_pad = _round_up(D, 128)
    B_pad = _round_up(B, 128)     # lane-dense matmul-N and (tk, B) f32 slabs

    SUB = 16                      # bf16 sublane packing
    tk = min(_round_up(blk, SUB), _round_up(K, SUB))
    # prefer >= 2 grid tiles so dual-TensorCore parts (v7x) can shard the anchor
    # axis via dimension_semantics=("parallel",)
    if K > 2 * SUB and _round_up(K, tk) // tk < 2:
        tk = max(SUB, _round_up((K + 1) // 2, SUB))
    K_pad = _round_up(K, tk)
    num_tiles = K_pad // tk

    f_p = jnp.pad(f, ((0, K_pad - K), (0, D_pad - D)))
    all_p = jnp.pad(inputs_bf, ((0, B_pad - B), (0, D_pad - D)))

    # explicit VMEM budget: resident inputs (single buffer) + double-buffered
    # anchor tile + f32 (tk, B_pad) temporaries + packed output, plus headroom.
    vmem_est = (
        B_pad * D_pad * 2              # resident `inputs` block, bf16, 1 buffer
        + 2 * (tk * D_pad * 2)         # anchor tile, double-buffered
        + 8 * (tk * B_pad * 4)         # f32 sim / mask / exp temporaries
        + 2 * (8 * 128 * 4)            # packed per-tile output block
    )
    vmem_limit = int(min(max(vmem_est + (6 << 20), 16 << 20), vmem_cap))

    kernel = functools.partial(_ms_loss_kernel, n_valid=B, k_valid=K)

    part = pl.pallas_call(
        kernel,
        grid=(num_tiles,),
        in_specs=[
            pl.BlockSpec((tk, D_pad), lambda i: (i, 0)),      # anchor tile
            _resident_spec(B_pad, D_pad),                     # inputs, resident
        ],
        out_specs=pl.BlockSpec((1, 8, 128), lambda i: (i, 0, 0)),
        out_shape=jax.ShapeDtypeStruct((num_tiles, 8, 128), jnp.float32),
        compiler_params=pltpu.CompilerParams(
            dimension_semantics=("parallel",),
            vmem_limit_bytes=vmem_limit),
    )(f_p, all_p)

    loss_sum = jnp.sum(part[:, 0, 0])
    p_num = jnp.sum(part[:, 0, 1])
    n_num = jnp.sum(part[:, 0, 2])

    loss = (loss_sum / K).reshape(1)        # matches torch.Tensor([x]) -> (1,)
    p_ratio = p_num / (4.0 * K)
    n_ratio = n_num / ((B - 5.0) * K)
    return loss, p_ratio, n_ratio


if __name__ == "__main__":
    key = jax.random.PRNGKey(0)
    num_classes = 48
    batch = 20   # 5 samples per identity -> K = 4 anchors

    k_in, k_tgt = jax.random.split(key)
    # small feature-like values so the mining thresholds are well-conditioned
    inputs = 0.1 * jax.random.normal(k_in, (batch, num_classes), dtype=jnp.float32)
    targets = jax.random.randint(k_tgt, (batch,), 0, num_classes)  # unused

    loss, p_ratio, n_ratio = multi_similarity_loss(inputs, targets)
    jax.block_until_ready((loss, p_ratio, n_ratio))
    assert bool(jnp.isfinite(loss).all())
    assert bool(jnp.isfinite(p_ratio)) and bool(jnp.isfinite(n_ratio))
    print("KERNEL_OK")
</pallas_src>

<mosaic_0001>
module attributes {stable_mosaic.version = 11 : i64} {
  func.func @_ms_loss_kernel(%arg0: i32, %arg1: memref<16x128xbf16, #tpu.memory_space<vmem>>, %arg2: memref<128x128xbf16, #tpu.memory_space<vmem>>, %arg3: memref<1x8x128xf32, #tpu.memory_space<vmem>>) attributes {dimension_semantics = [#tpu.dimension_semantics<parallel>], iteration_bounds = array<i64: 1>, scalar_prefetch = 0 : i64, scratch_operands = 0 : i64, tpu.core_type = #tpu.core_type<tc>, window_params = [{transform_indices = @transform_0, window_bounds = array<i64: 16, 128>}, {pipeline_mode = #tpu.pipeline_mode<synchronous>, transform_indices = @transform_1, window_bounds = array<i64: 128, 128>}, {transform_indices = @transform_2, window_bounds = array<i64: 1, 8, 128>}]} {
    %c16_i32 = arith.constant 16 : i32
    %0 = arith.muli %arg0, %c16_i32 : i32
    %c0 = arith.constant 0 : index
    %c0_0 = arith.constant 0 : index
    %1 = vector.load %arg1[%c0, %c0_0] : memref<16x128xbf16, #tpu.memory_space<vmem>>, vector<16x128xbf16>
    %c0_1 = arith.constant 0 : index
    %c0_2 = arith.constant 0 : index
    %2 = vector.load %arg2[%c0_1, %c0_2] : memref<128x128xbf16, #tpu.memory_space<vmem>>, vector<128x128xbf16>
    %cst = arith.constant dense<0.000000e+00> : vector<16x128xf32>
    %3 = tpu.matmul %1, %2, %cst {dimension_numbers = #tpu.dot_dimension_numbers<[1], [1], [0], [0], [0, 0, 1, 0], [], []>} : vector<16x128xbf16>, vector<128x128xbf16>, vector<16x128xf32> -> vector<16x128xf32>
    %4 = tpu.iota {dimensions = array<i32: 1>} : vector<16x128xi32>
    %5 = tpu.iota {dimensions = array<i32: 0>} : vector<16x1xi32>
    %6 = vector.broadcast %0 : i32 to vector<16x1xi32>
    %7 = arith.addi %5, %6 : vector<16x1xi32>
    %c5_i32 = arith.constant 5 : i32
    %8 = vector.broadcast %c5_i32 : i32 to vector<16x1xi32>
    %9 = arith.muli %7, %8 : vector<16x1xi32>
    %10 = vector.broadcast %9 : vector<16x1xi32> to vector<16x128xi32>
    %11 = arith.subi %4, %10 : vector<16x128xi32>
    %c20_i32 = arith.constant 20 : i32
    %12 = vector.broadcast %c20_i32 : i32 to vector<16x128xi32>
    %13 = arith.cmpi slt, %4, %12 : vector<16x128xi32>
    %c4_i32 = arith.constant 4 : i32
    %14 = vector.broadcast %c4_i32 : i32 to vector<16x128xi32>
    %15 = arith.cmpi ugt, %11, %14 : vector<16x128xi32>
    %16 = arith.andi %15, %13 : vector<16x128xi1>
    %c1_i32 = arith.constant 1 : i32
    %17 = vector.broadcast %c1_i32 : i32 to vector<16x128xi32>
    %18 = arith.subi %11, %17 : vector<16x128xi32>
    %c3_i32 = arith.constant 3 : i32
    %19 = vector.broadcast %c3_i32 : i32 to vector<16x128xi32>
    %20 = arith.cmpi ule, %18, %19 : vector<16x128xi32>
    %cst_3 = arith.constant 0xFF800000 : f32
    %21 = vector.broadcast %cst_3 : f32 to vector<16x128xf32>
    %22 = arith.select %16, %3, %21 : vector<16x128xi1>, vector<16x128xf32>
    %cst_4 = arith.constant dense<0xFF800000> : vector<16xf32>
    %23 = vector.multi_reduction <maximumf>, %22, %cst_4 [1] : vector<16x128xf32> to vector<16xf32>
    %24 = vector.shape_cast %23 : vector<16xf32> to vector<16x1xf32>
    %cst_5 = arith.constant 0x7F800000 : f32
    %25 = vector.broadcast %cst_5 : f32 to vector<16x128xf32>
    %26 = arith.select %20, %3, %25 : vector<16x128xi1>, vector<16x128xf32>
    %cst_6 = arith.constant dense<0x7F800000> : vector<16xf32>
    %27 = vector.multi_reduction <minimumf>, %26, %cst_6 [1] : vector<16x128xf32> to vector<16xf32>
    %28 = vector.shape_cast %27 : vector<16xf32> to vector<16x1xf32>
    %cst_7 = arith.constant 1.000000e-01 : f32
    %29 = vector.broadcast %cst_7 : f32 to vector<16x1xf32>
    %30 = arith.addf %24, %29 : vector<16x1xf32>
    %31 = vector.broadcast %30 : vector<16x1xf32> to vector<16x128xf32>
    %32 = arith.cmpf olt, %3, %31 : vector<16x128xf32>
    %33 = arith.andi %20, %32 : vector<16x128xi1>
    %cst_8 = arith.constant 1.000000e-01 : f32
    %34 = vector.broadcast %cst_8 : f32 to vector<16x1xf32>
    %35 = arith.subf %28, %34 : vector<16x1xf32>
    %36 = vector.broadcast %35 : vector<16x1xf32> to vector<16x128xf32>
    %37 = arith.cmpf ogt, %3, %36 : vector<16x128xf32>
    %38 = arith.andi %16, %37 : vector<16x128xi1>
    %cst_9 = arith.constant 1.000000e+00 : f32
    %39 = vector.broadcast %cst_9 : f32 to vector<16x128xf32>
    %40 = arith.subf %3, %39 : vector<16x128xf32>
    %cst_10 = arith.constant -2.000000e+00 : f32
    %41 = vector.broadcast %cst_10 : f32 to vector<16x128xf32>
    %42 = arith.mulf %41, %40 : vector<16x128xf32>
    %cst_11 = arith.constant 0xFF800000 : f32
    %43 = vector.broadcast %cst_11 : f32 to vector<16x128xf32>
    %44 = arith.select %33, %42, %43 : vector<16x128xi1>, vector<16x128xf32>
    %cst_12 = arith.constant dense<0xFF800000> : vector<16xf32>
    %45 = vector.multi_reduction <maximumf>, %44, %cst_12 [1] : vector<16x128xf32> to vector<16xf32>
    %46 = vector.shape_cast %45 : vector<16xf32> to vector<16x1xf32>
    %cst_13 = arith.constant 0.000000e+00 : f32
    %47 = vector.broadcast %cst_13 : f32 to vector<16x1xf32>
    %48 = arith.maximumf %46, %47 : vector<16x1xf32>
    %49 = vector.broadcast %48 : vector<16x1xf32> to vector<16x128xf32>
    %50 = arith.subf %44, %49 : vector<16x128xf32>
    %51 = math.exp %50 : vector<16x128xf32>
    %cst_14 = arith.constant dense<0.000000e+00> : vector<16xf32>
    %52 = vector.multi_reduction <add>, %51, %cst_14 [1] : vector<16x128xf32> to vector<16xf32>
    %53 = vector.shape_cast %52 : vector<16xf32> to vector<16x1xf32>
    %cst_15 = arith.constant 0.000000e+00 : f32
    %54 = vector.broadcast %cst_15 : f32 to vector<16x1xf32>
    %55 = arith.subf %54, %48 : vector<16x1xf32>
    %56 = math.exp %55 : vector<16x1xf32>
    %57 = arith.addf %53, %56 : vector<16x1xf32>
    %58 = math.log %57 : vector<16x1xf32>
    %59 = arith.addf %48, %58 : vector<16x1xf32>
    %cst_16 = arith.constant 2.000000e+00 : f32
    %60 = vector.broadcast %cst_16 : f32 to vector<16x1xf32>
    %61 = arith.divf %59, %60 : vector<16x1xf32>
    %cst_17 = arith.constant 1.000000e+00 : f32
    %62 = vector.broadcast %cst_17 : f32 to vector<16x128xf32>
    %63 = arith.subf %3, %62 : vector<16x128xf32>
    %cst_18 = arith.constant 1.000000e+01 : f32
    %64 = vector.broadcast %cst_18 : f32 to vector<16x128xf32>
    %65 = arith.mulf %64, %63 : vector<16x128xf32>
    %cst_19 = arith.constant 0xFF800000 : f32
    %66 = vector.broadcast %cst_19 : f32 to vector<16x128xf32>
    %67 = arith.select %38, %65, %66 : vector<16x128xi1>, vector<16x128xf32>
    %cst_20 = arith.constant dense<0xFF800000> : vector<16xf32>
    %68 = vector.multi_reduction <maximumf>, %67, %cst_20 [1] : vector<16x128xf32> to vector<16xf32>
    %69 = vector.shape_cast %68 : vector<16xf32> to vector<16x1xf32>
    %cst_21 = arith.constant 0.000000e+00 : f32
    %70 = vector.broadcast %cst_21 : f32 to vector<16x1xf32>
    %71 = arith.maximumf %69, %70 : vector<16x1xf32>
    %72 = vector.broadcast %71 : vector<16x1xf32> to vector<16x128xf32>
    %73 = arith.subf %67, %72 : vector<16x128xf32>
    %74 = math.exp %73 : vector<16x128xf32>
    %cst_22 = arith.constant dense<0.000000e+00> : vector<16xf32>
    %75 = vector.multi_reduction <add>, %74, %cst_22 [1] : vector<16x128xf32> to vector<16xf32>
    %76 = vector.shape_cast %75 : vector<16xf32> to vector<16x1xf32>
    %cst_23 = arith.constant 0.000000e+00 : f32
    %77 = vector.broadcast %cst_23 : f32 to vector<16x1xf32>
    %78 = arith.subf %77, %71 : vector<16x1xf32>
    %79 = math.exp %78 : vector<16x1xf32>
    %80 = arith.addf %76, %79 : vector<16x1xf32>
    %81 = math.log %80 : vector<16x1xf32>
    %82 = arith.addf %71, %81 : vector<16x1xf32>
    %cst_24 = arith.constant 1.000000e+01 : f32
    %83 = vector.broadcast %cst_24 : f32 to vector<16x1xf32>
    %84 = arith.divf %82, %83 : vector<16x1xf32>
    %85 = arith.extui %33 : vector<16x128xi1> to vector<16x128xi32>
    %86 = arith.sitofp %85 : vector<16x128xi32> to vector<16x128xf32>
    %cst_25 = arith.constant dense<0.000000e+00> : vector<16xf32>
    %87 = vector.multi_reduction <add>, %86, %cst_25 [1] : vector<16x128xf32> to vector<16xf32>
    %88 = vector.shape_cast %87 : vector<16xf32> to vector<16x1xf32>
    %89 = arith.extui %38 : vector<16x128xi1> to vector<16x128xi32>
    %90 = arith.sitofp %89 : vector<16x128xi32> to vector<16x128xf32>
    %cst_26 = arith.constant dense<0.000000e+00> : vector<16xf32>
    %91 = vector.multi_reduction <add>, %90, %cst_26 [1] : vector<16x128xf32> to vector<16xf32>
    %92 = vector.shape_cast %91 : vector<16xf32> to vector<16x1xf32>
    %93 = tpu.iota {dimensions = array<i32: 0>} : vector<16x1xi32>
    %94 = vector.broadcast %0 : i32 to vector<16x1xi32>
    %95 = arith.addi %93, %94 : vector<16x1xi32>
    %c4_i32_27 = arith.constant 4 : i32
    %96 = vector.broadcast %c4_i32_27 : i32 to vector<16x1xi32>
    %97 = arith.cmpi slt, %95, %96 : vector<16x1xi32>
    %98 = arith.extui %97 : vector<16x1xi1> to vector<16x1xi32>
    %99 = arith.sitofp %98 : vector<16x1xi32> to vector<16x1xf32>
    %100 = arith.addf %61, %84 : vector<16x1xf32>
    %101 = arith.mulf %100, %99 : vector<16x1xf32>
    %cst_28 = arith.constant dense<0.000000e+00> : vector<1xf32>
    %102 = vector.multi_reduction <add>, %101, %cst_28 [0] : vector<16x1xf32> to vector<1xf32>
    %103 = vector.shape_cast %102 : vector<1xf32> to vector<1x1xf32>
    %104 = arith.mulf %88, %99 : vector<16x1xf32>
    %cst_29 = arith.constant dense<0.000000e+00> : vector<1xf32>
    %105 = vector.multi_reduction <add>, %104, %cst_29 [0] : vector<16x1xf32> to vector<1xf32>
    %106 = vector.shape_cast %105 : vector<1xf32> to vector<1x1xf32>
    %107 = arith.mulf %92, %99 : vector<16x1xf32>
    %cst_30 = arith.constant dense<0.000000e+00> : vector<1xf32>
    %108 = vector.multi_reduction <add>, %107, %cst_30 [0] : vector<16x1xf32> to vector<1xf32>
    %109 = vector.shape_cast %108 : vector<1xf32> to vector<1x1xf32>
    %110 = tpu.iota {dimensions = array<i32: 1>} : vector<8x128xi32>
    %c0_i32 = arith.constant 0 : i32
    %111 = vector.broadcast %c0_i32 : i32 to vector<8x128xi32>
    %112 = arith.cmpi eq, %110, %111 : vector<8x128xi32>
    %c1_i32_31 = arith.constant 1 : i32
    %113 = vector.broadcast %c1_i32_31 : i32 to vector<8x128xi32>
    %114 = arith.cmpi eq, %110, %113 : vector<8x128xi32>
    %115 = vector.shape_cast %106 : vector<1x1xf32> to vector<1x1xf32>
    %116 = vector.broadcast %115 : vector<1x1xf32> to vector<8x128xf32>
    %117 = vector.shape_cast %109 : vector<1x1xf32> to vector<1x1xf32>
    %118 = vector.broadcast %117 : vector<1x1xf32> to vector<8x128xf32>
    %119 = arith.select %114, %116, %118 : vector<8x128xi1>, vector<8x128xf32>
    %120 = vector.shape_cast %103 : vector<1x1xf32> to vector<1x1xf32>
    %121 = vector.broadcast %120 : vector<1x1xf32> to vector<8x128xf32>
    %122 = arith.select %112, %121, %119 : vector<8x128xi1>, vector<8x128xf32>
    %123 = vector.shape_cast %122 : vector<8x128xf32> to vector<1x8x128xf32>
    %c0_32 = arith.constant 0 : index
    %c0_33 = arith.constant 0 : index
    %c0_34 = arith.constant 0 : index
    %124 = vector.load %arg3[%c0_32, %c0_33, %c0_34] : memref<1x8x128xf32, #tpu.memory_space<vmem>>, vector<1x8x128xf32>
    tpu.vector_store %arg3[%c0_32, %c0_33, %c0_34], %123 {strides = array<i32>} : memref<1x8x128xf32, #tpu.memory_space<vmem>>, vector<1x8x128xf32>,
    return
  }
  func.func @transform_0(%arg0: i32) -> (i32, i32) {
    %c0_i32 = arith.constant 0 : i32
    %c0_i32_0 = arith.constant 0 : i32
    return %arg0, %c0_i32 : i32, i32
  }
  func.func @transform_1(%arg0: i32) -> (i32, i32) {
    %c0_i32 = arith.constant 0 : i32
    %c0_i32_0 = arith.constant 0 : i32
    %c0_i32_1 = arith.constant 0 : i32
    return %c0_i32, %c0_i32_0 : i32, i32
  }
  func.func @transform_2(%arg0: i32) -> (i32, i32, i32) {
    %c0_i32 = arith.constant 0 : i32
    %c0_i32_0 = arith.constant 0 : i32
    %c0_i32_1 = arith.constant 0 : i32
    return %arg0, %c0_i32, %c0_i32_0 : i32, i32, i32
  }
}

</mosaic_0001>

<bundles_post_ra>
// kernel: tpu_custom_call.1
= control target key start
LH: loop header
LB: loop body
LE: loop exit
PB: predicated region body
PF: predicated region fallthrough
CT: control target
= control target key end

     0   :  { %7 = vsyncpa [#allocation3], 0  ;;  %s648_s0 = inlined_call_operand.hbm [shape: bf16[16,128], index: 0, kind: input, shape index: {}]   ;;  %s649_s1 = inlined_call_operand.hbm [shape: bf16[128,128], index: 1, kind: input, shape index: {}]   ;;  %s650_s2 = inlined_call_operand.hbm [shape: f32[1,8,128], index: 2, kind: output, shape index: {}]  }
   0x1   :  { %8 = vsyncpa [#allocation6], 0 }
   0x2   :  { %9 = vsyncpa [#allocation4], 0  ;;  %s14_s11 = sshll.u32 %s648_s0, 4  ;;  %s520_s12 = smov [#allocation2]   ;;  %s15_s11 = int_to_ptr.hbm [resolvable:$true] %s14_s11 }
   0x3   :  { %s16_s13 = sshll.u32 %s520_s12, 4  ;;  %s27_s16 = sshll.u32 %s649_s1, 4  ;;  %s17_s13 = int_to_ptr.vmem [resolvable:$true] %s16_s13  ;;  %s28_s16 = int_to_ptr.hbm [resolvable:$true] %s27_s16 }
   0x4   :  { %s521_s17 = smov 64   ;;  %s522_s18 = smov 4  }
   0x5   :  { %22 = dma.hbm_to_vmem [thread:$0]  %s15_s11, 128, %s17_s13, [#allocation3], %s521_s17, %s521_s17, %s522_s18  }
   0x6   :  { %s523_s19 = smov [#allocation5]  }
   0x7   :  { %s29_s20 = sshll.u32 %s523_s19, 4  ;;  %s30_s20 = int_to_ptr.vmem [resolvable:$true] %s29_s20 }
   0x8   :  { %35 = dma.hbm_to_vmem [thread:$0]  %s28_s16, 1024, %s30_s20, [#allocation6], %s521_s17, %s521_s17, %s522_s18  }
   0x9   :  { %514 = dma.done.wait [#allocation3], 128  }
   0xa   :  { %515 = vsyncadd [#allocation3], 4294967168 }
   0xb   :  { %516 = dma.done.wait [#allocation6], 1024  }
   0xc   :  { %517 = vsyncadd [#allocation6], 4294966272  ;;  %v405_v0 = vld [vmem:[#allocation5 + $0x38] sm:$0xff]  ;;  %v404_v1 = vld [vmem:[#allocation5 + $0x30] sm:$0xff]  ;;  %v131_v9 = vlaneseq  ;;  %v525_v21 = vmov 2.0   ;;  %s527_s0 = smov [#allocation7]  }
   0xd   :  { %117 = vmatpush.bf16.xpose.msra.mxu0 %v405_v0  ;;  %v403_v2 = vld [vmem:[#allocation5 + $0x28] sm:$0xff]  ;;  %v402_v3 = vld [vmem:[#allocation5 + $0x20] sm:$0xff]  ;;  %v401_v4 = vld [vmem:[#allocation5 + $0x18] sm:$0xff]  ;;  %s333_s1 = sshll.u32 %s527_s0, 4  ;;  %s335_s23 = sshll.u32 %s650_s2, 4  ;;  %s334_s1 = int_to_ptr.vmem [resolvable:$true] %s333_s1  ;;  %s336_s23 = int_to_ptr.hbm [resolvable:$true] %s335_s23 }
   0xe   :  { %v400_v5 = vld [vmem:[#allocation5 + $0x10] sm:$0xff]  ;;  %v399_v6 = vld [vmem:[#allocation5 + $0x8] sm:$0xff]  ;;  %v398_v7 = vld [vmem:[#allocation5] sm:$0xff]  ;;  %v549_v10 = vshrl.u32 %v131_v9, 7  ;;  %v551_v11 = vand.u32 127, %v131_v9 }
   0xf   :  { %v397_v8 = vld [vmem:[#allocation2] sm:$0xff] }
  0x10   :  { %v139_v12 = vmul.u32 5, %v549_v10  ;;  %v135_v14 = vadd.s32 8, %v549_v10  ;;  %vm143_vm0 = vcmp.lt.s32.totalorder %v551_v11, 20  ;;  %vm288_vm15 = vcmp.lt.s32.totalorder %v549_v10, 4 }
  0x12   :  { %v141_v13 = vsub.s32 %v551_v11, %v139_v12  ;;  %v140_v16 = vmul.u32 5, %v135_v14 }
  0x14   :  { %v384_v15 = vadd.s32 4294967295, %v141_v13  ;;  %v382_v17 = vxor.u32 2147483648, %v141_v13  ;;  %v142_v19 = vsub.s32 %v551_v11, %v140_v16  ;;  %v524_v13 = vmov 0.0  }
  0x15   :  { %118 = vmatpush.bf16.xpose.msra.mxu0 %v404_v1 }
  0x16   :  { %v386_v18 = vxor.u32 2147483648, %v384_v15  ;;  %vm146_vm1 = vcmp.gt.s32.totalorder %v382_v17, 2147483652  ;;  %v385_v22 = vadd.s32 4294967295, %v142_v19  ;;  %v383_v23 = vxor.u32 2147483648, %v142_v19 }
  0x17   :  { %vm562_vm3 = vmand %vm146_vm1, %vm143_vm0 }
  0x18   :  { %vm558_vm2 = vcmp.le.s32.totalorder %v386_v18, 2147483651  ;;  %v387_v27 = vxor.u32 2147483648, %v385_v22  ;;  %vm149_vm4 = vcmp.gt.s32.totalorder %v383_v23, 2147483652  ;;  %v526_v23 = vmov 10.0  }
  0x19   :  { %vm574_vm6 = vmand %vm149_vm4, %vm143_vm0 }
  0x1a   :  { %vm570_vm5 = vcmp.le.s32.totalorder %v387_v27, 2147483651 }
  0x1d   :  { %119 = vmatpush.bf16.xpose.msra.mxu0 %v403_v2 }
  0x25   :  { %120 = vmatpush.bf16.xpose.msra.mxu0 %v402_v3 }
  0x2d   :  { %121 = vmatpush.bf16.xpose.msra.mxu0 %v401_v4 }
  0x35   :  { %122 = vmatpush.bf16.xpose.msra.mxu0 %v400_v5 }
  0x3d   :  { %123 = vmatpush.bf16.xpose.msra.mxu0 %v399_v6 }
  0x45   :  { %124 = vmatpush.bf16.xpose.msra.mxu0 %v398_v7 }
  0x4c   :  { %125 = vmatmul.bf16.vlgmr.msra.gmra.mxu0 %v397_v8 }
  0xc9   :  { %v126_v24 = vpop.f32.mrf.mxu0 }
  0xca   :  { %v166_v25 = vsel %vm558_vm2, %v126_v24, inf  ;;  %v160_v26 = vsel %vm562_vm3, %v126_v24, -inf  ;;  %v390_v33 = vadd.f32 -1.0, %v126_v24 }
  0xcb   :  { %168 = vmin.xlane.f32.xlu1 %v166_v25  ;;  %162 = vmax.xlane.f32.xlu0 %v160_v26 }
  0xcc   :  { %v186_v38 = vmul.f32 -2.0, %v390_v33  ;;  %v229_v40 = vmul.f32 10.0, %v390_v33 }
  0xd1   :  { %v128_v30 = vpop.f32.mrf.mxu0 }
  0xd2   :  { %v167_v31 = vsel %vm570_vm5, %v128_v30, inf  ;;  %v161_v32 = vsel %vm574_vm6, %v128_v30, -inf  ;;  %v391_v44 = vadd.f32 -1.0, %v128_v30 }
  0xd3   :  { %170 = vmin.xlane.f32.xlu1 %v167_v31  ;;  %164 = vmax.xlane.f32.xlu0 %v161_v32 }
  0xd4   :  { %v230_v49 = vmul.f32 10.0, %v391_v44  ;;  %v187_v51 = vmul.f32 -2.0, %v391_v44 }
 0x13e   :  { %v169_v34 = vpop.xlane.xlu1 %168  ;;  %v163_v35 = vpop.xlane.xlu0 %162 }
 0x13f   :  { %v388_v36 = vadd.f32 -0.1, %v169_v34  ;;  %v172_v37 = vadd.f32 0.1, %v163_v35 }
 0x141   :  { %vm174_vm7 = vcmp.lt.f32.partialorder %v126_v24, %v172_v37  ;;  %vm180_vm8 = vcmp.gt.f32.partialorder %v126_v24, %v388_v36 }
 0x142   :  { %vm584_vm9 = vmand %vm558_vm2, %vm174_vm7  ;;  %vm324_vm2 = vcmp.eq.s32.totalorder %v551_v11, 1 }
 0x143   :  { %v188_v41 = vsel %vm584_vm9, %v186_v38, -inf  ;;  %vm592_vm10 = vmand %vm562_vm3, %vm180_vm8  ;;  %v392_v16 = vsel %vm584_vm9, 1.0, %v524_v13  ;;  %vm323_vm3 = vcmp.eq.s32.totalorder %v551_v11, 0 }
 0x144   :  { %190 = vmax.xlane.f32.xlu2 %v188_v41  ;;  %v231_v43 = vsel %vm592_vm10, %v229_v40, -inf  ;;  %v394_v15 = vsel %vm592_vm10, 1.0, %v524_v13 }
 0x145   :  { %233 = vmax.xlane.f32.xlu0 %v231_v43 }
 0x146   :  { %v171_v45 = vpop.xlane.xlu1 %170  ;;  %v165_v46 = vpop.xlane.xlu0 %164 }
 0x147   :  { %v389_v47 = vadd.f32 -0.1, %v171_v45  ;;  %v173_v48 = vadd.f32 0.1, %v165_v46 }
 0x149   :  { %vm181_vm11 = vcmp.gt.f32.partialorder %v128_v30, %v389_v47  ;;  %vm175_vm12 = vcmp.lt.f32.partialorder %v128_v30, %v173_v48 }
 0x14a   :  { %vm600_vm13 = vmand %vm574_vm6, %vm181_vm11 }
 0x14b   :  { %v232_v52 = vsel %vm600_vm13, %v230_v49, -inf  ;;  %vm608_vm14 = vmand %vm570_vm5, %vm175_vm12  ;;  %v395_v17 = vsel %vm600_vm13, 1.0, %v524_v13 }
 0x14c   :  { %235 = vmax.xlane.f32.xlu1 %v232_v52  ;;  %v189_v54 = vsel %vm608_vm14, %v187_v51, -inf  ;;  %v393_v14 = vsel %vm608_vm14, 1.0, %v524_v13 }
 0x14d   :  { %192 = vmax.xlane.f32.xlu2 %v189_v54 }
 0x1b7   :  { %v191_v55 = vpop.xlane.xlu2 %190 }
 0x1b8   :  { %v614_v56 = vmax.f32 %v191_v55, 0.0  ;;  %v234_v57 = vpop.xlane.xlu0 %233 }
 0x1b9   :  { %v616_v58 = vmax.f32 %v234_v57, 0.0 }
 0x1ba   :  { %v196_v59 = vsub.f32 %v188_v41, %v614_v56  ;;  %v206_v18 = vsub.f32 0.0, %v614_v56 }
 0x1bb   :  { %v239_v60 = vsub.f32 %v231_v43, %v616_v58  ;;  %v249_v19 = vsub.f32 0.0, %v616_v58 }
 0x1bc   :  { %v198_v61 = vmul.f32 1.442695, %v196_v59  ;;  %v208_v20 = vmul.f32 1.442695, %v206_v18  ;;  %v396_v59 = vsel %vm288_vm15, 1.0, %v524_v13 }
 0x1bd   :  { %v241_v62 = vmul.f32 1.442695, %v239_v60  ;;  %v251_v22 = vmul.f32 1.442695, %v249_v19 }
 0x1be   :  { %414 = vpow2.f32 %v198_v61 }
 0x1bf   :  { %v236_v63 = vpop.xlane.xlu1 %235  ;;  %416 = vpow2.f32 %v241_v62 }
 0x1c0   :  { %v620_v0 = vmax.f32 %v236_v63, 0.0  ;;  %v193_v1 = vpop.xlane.xlu2 %192 }
 0x1c1   :  { %v622_v2 = vmax.f32 %v193_v1, 0.0 }
 0x1c2   :  { %v240_v3 = vsub.f32 %v232_v52, %v620_v0  ;;  %v250_v24 = vsub.f32 0.0, %v620_v0 }
 0x1c3   :  { %v197_v4 = vsub.f32 %v189_v54, %v622_v2  ;;  %v207_v25 = vsub.f32 0.0, %v622_v2 }
 0x1c4   :  { %v415_v5 = vpop.eup %414  ;;  %v243_v6 = vmul.f32 1.442695, %v240_v3  ;;  %v253_v28 = vmul.f32 1.442695, %v250_v24 }
 0x1c5   :  { %v200_v7 = vmul.f32 1.442695, %v197_v4  ;;  %202 = vadd.xlane.f32.xlu2 %v415_v5  ;;  %v417_v8 = vpop.eup %416  ;;  %v210_v30 = vmul.f32 1.442695, %v207_v25 }
 0x1c6   :  { %418 = vpow2.f32 %v243_v6  ;;  %245 = vadd.xlane.f32.xlu1 %v417_v8 }
 0x1c7   :  { %420 = vpow2.f32 %v200_v7 }
 0x1c8   :  { %422 = vrcp.f32 %v525_v21 }
 0x1c9   :  { %424 = vrcp.f32 %v526_v23 }
 0x1ca   :  { %426 = vpow2.f32 %v208_v20 }
 0x1cb   :  { %428 = vpow2.f32 %v251_v22 }
 0x1cc   :  { %v419_v9 = vpop.eup %418  ;;  %430 = vpow2.f32 %v253_v28 }
 0x1cd   :  { %247 = vadd.xlane.f32.xlu2 %v419_v9  ;;  %v421_v12 = vpop.eup %420 }
 0x1ce   :  { %204 = vadd.xlane.f32.xlu0 %v421_v12  ;;  %278 = vadd.xlane.f32.xlu1 %v393_v14  ;;  %v423_v26 = vpop.eup %422 }
 0x1cf   :  { %v425_v27 = vpop.eup %424  ;;  %v221_v32 = vmul.f32 2.0, %v423_v26  ;;  %vm225_vm0 = vweird.f32 %v423_v26 }
 0x1d0   :  { %v427_v29 = vpop.eup %426  ;;  %v264_v34 = vmul.f32 10.0, %v425_v27  ;;  %vm268_vm1 = vweird.f32 %v425_v27 }
 0x1d1   :  { %v429_v35 = vpop.eup %428  ;;  %v222_v38 = vsub.f32 1.0, %v221_v32 }
 0x1d2   :  { %v265_v39 = vsub.f32 1.0, %v264_v34  ;;  %v431_v40 = vpop.eup %430 }
 0x1d3   :  { %v223_v43 = vmul.f32 %v423_v26, %v222_v38 }
 0x1d4   :  { %v266_v44 = vmul.f32 %v425_v27, %v265_v39 }
 0x1d5   :  { %284 = vadd.xlane.f32.xlu2 %v394_v15  ;;  %v224_v52 = vadd.f32 %v423_v26, %v223_v43 }
 0x1d6   :  { %276 = vadd.xlane.f32.xlu0 %v392_v16  ;;  %v267_v53 = vadd.f32 %v425_v27, %v266_v44 }
 0x1d7   :  { %v226_v61 = vsel %vm225_vm0, %v423_v26, %v224_v52 }
 0x1d8   :  { %v269_v62 = vsel %vm268_vm1, %v425_v27, %v267_v53 }
 0x1de   :  { %286 = vadd.xlane.f32.xlu0 %v395_v17 }
 0x238   :  { %v203_v31 = vpop.xlane.xlu2 %202 }
 0x239   :  { %v212_v33 = vadd.f32 %v427_v29, %v203_v31  ;;  %v246_v36 = vpop.xlane.xlu1 %245 }
 0x23a   :  { %v255_v37 = vadd.f32 %v429_v35, %v246_v36 }
 0x23b   :  { %432 = vlog2.f32 %v212_v33 }
 0x23c   :  { %434 = vpow2.f32 %v210_v30 }
 0x23d   :  { %436 = vlog2.f32 %v255_v37 }
 0x240   :  { %v248_v41 = vpop.xlane.xlu2 %247 }
 0x241   :  { %v433_v42 = vpop.eup %432  ;;  %v256_v45 = vadd.f32 %v431_v40, %v248_v41  ;;  %v205_v47 = vpop.xlane.xlu0 %204 }
 0x242   :  { %v435_v46 = vpop.eup %434  ;;  %v215_v50 = vmul.f32 0.6931472, %v433_v42  ;;  %v279_v57 = vpop.xlane.xlu1 %278 }
 0x243   :  { %v437_v48 = vpop.eup %436  ;;  %438 = vlog2.f32 %v256_v45  ;;  %v213_v49 = vadd.f32 %v435_v46, %v205_v47  ;;  %v306_v4 = vmul.f32 0.0, %v279_v57 }
 0x244   :  { %v258_v51 = vmul.f32 0.6931472, %v437_v48  ;;  %v218_v54 = vadd.f32 %v215_v50, %v614_v56 }
 0x245   :  { %440 = vlog2.f32 %v213_v49 }
 0x246   :  { %v261_v55 = vadd.f32 %v258_v51, %v616_v58  ;;  %v227_v6 = vmul.f32 %v226_v61, %v218_v54 }
 0x248   :  { %v270_v7 = vmul.f32 %v269_v62, %v261_v55  ;;  %v285_v13 = vpop.xlane.xlu2 %284 }
 0x249   :  { %v439_v60 = vpop.eup %438  ;;  %v277_v1 = vpop.xlane.xlu0 %276  ;;  %v314_v19 = vmul.f32 %v396_v59, %v285_v13 }
 0x24a   :  { %v260_v63 = vmul.f32 0.6931472, %v439_v60  ;;  %v305_v5 = vmul.f32 %v396_v59, %v277_v1  ;;  %v294_v15 = vadd.f32 %v270_v7, %v227_v6 }
 0x24b   :  { %v441_v3 = vpop.eup %440 }
 0x24c   :  { %v262_v10 = vadd.f32 %v260_v63, %v620_v0  ;;  %v217_v8 = vmul.f32 0.6931472, %v441_v3  ;;  %v307_v9 = vadd.f32 %v306_v4, %v305_v5  ;;  %v296_v21 = vmul.f32 %v396_v59, %v294_v15 }
 0x24e   :  { %v271_v12 = vmul.f32 %v269_v62, %v262_v10  ;;  %v219_v56 = vadd.f32 %v217_v8, %v622_v2  ;;  %v308_v58 = vrot.slane %v307_v9, 4 }
 0x250   :  { %v228_v14 = vmul.f32 %v226_v61, %v219_v56  ;;  %v309_v16 = vadd.f32 %v308_v58, %v307_v9 }
 0x251   :  { %v287_v18 = vpop.xlane.xlu0 %286 }
 0x252   :  { %v295_v17 = vadd.f32 %v271_v12, %v228_v14  ;;  %v315_v20 = vmul.f32 0.0, %v287_v18  ;;  %v310_v23 = vrot.slane %v309_v16, 2 }
 0x254   :  { %v297_v22 = vmul.f32 0.0, %v295_v17  ;;  %v316_v24 = vadd.f32 %v315_v20, %v314_v19  ;;  %v311_v27 = vadd.f32 %v310_v23, %v309_v16 }
 0x256   :  { %v298_v25 = vadd.f32 %v297_v22, %v296_v21  ;;  %v317_v0 = vrot.slane %v316_v24, 4  ;;  %v312_v31 = vrot.slane %v311_v27, 1 }
 0x258   :  { %v299_v26 = vrot.slane %v298_v25, 4  ;;  %v318_v28 = vadd.f32 %v317_v0, %v316_v24  ;;  %v313_v36 = vadd.f32 %v312_v31, %v311_v27 }
 0x25a   :  { %v300_v29 = vadd.f32 %v299_v26, %v298_v25  ;;  %v319_v2 = vrot.slane %v318_v28, 2 }
 0x25c   :  { %v301_v30 = vrot.slane %v300_v29, 2  ;;  %v320_v32 = vadd.f32 %v319_v2, %v318_v28 }
 0x25e   :  { %v302_v33 = vadd.f32 %v301_v30, %v300_v29  ;;  %v321_v34 = vrot.slane %v320_v32, 1 }
 0x260   :  { %v303_v35 = vrot.slane %v302_v33, 1  ;;  %v322_v37 = vadd.f32 %v321_v34, %v320_v32 }
 0x262   :  { %v304_v38 = vadd.f32 %v303_v35, %v302_v33  ;;  %v325_v39 = vsel %vm324_vm2, %v313_v36, %v322_v37 }
 0x264   :  { %v326_v40 = vsel %vm323_vm3, %v304_v38, %v325_v39 }
 0x265   :  { %327 = vst [vmem:[#allocation7] sm:$0xff] %v326_v40 }
 0x266   :  { %338 = dma.vmem_to_hbm [thread:$0]  %s334_s1, 128, %s336_s23, [#allocation4]  }
 0x267   :  { %518 = dma.done.wait [#allocation4], 128  }
 0x268   :  { %519 = vsyncadd [#allocation4], 4294967168 }
 0x269   :  { %343 = vsyncpa [#allocation3], 1 }
 0x26a   :  { %344 = vsyncpa [#allocation6], 1 }
 0x26b   :  { %345 = vsyncpa [#allocation4], 1 }

</bundles_post_ra>
